<compile_context>
chip_gen: v7x
topology: tpu7x:2x2x1
jax: 0.10.0
libtpu: 0.0.40
codegen_flags: <defaults>
</compile_context>

<pallas_src>
import jax
import jax.numpy as jnp
from jax.experimental import pallas as pl
from jax.experimental.pallas import tpu as pltpu


def _linear_vpu(w, b, x):
    """w: (out, k), b: (out, 1), x: (k, n) -> (out, n).

    Unrolled broadcast-multiply-add chain on the VPU; k in {8, 6, 4} so the
    whole layer is a handful of vmul/vadd per output row, no MXU involved.
    """
    k = w.shape[1]
    acc = w[:, 0:1] * x[0:1, :] + b          # fold bias broadcast in once
    for j in range(1, k):
        acc = acc + w[:, j:j + 1] * x[j:j + 1, :]
    return acc


def mlp_kernel(x_ref, w1_ref, b1_ref, w2_ref, b2_ref, w3_ref, b3_ref, o_ref):
    x = x_ref[...]                                                   # (8, TB)
    h1 = jax.nn.sigmoid(_linear_vpu(w1_ref[...], b1_ref[...], x))    # (6, TB)
    h2 = jax.nn.sigmoid(_linear_vpu(w2_ref[...], b2_ref[...], h1))   # (4, TB)
    o_ref[...] = jax.nn.sigmoid(
        _linear_vpu(w3_ref[...], b3_ref[...], h2))                   # (1, TB)


def mlp_forward(x, w1, b1, w2, b2, w3, b3, *, tile_b=128):
    """x: (B, 8) like torch.nn.Linear.  Returns (B, 1)."""
    B = x.shape[0]
    n_tiles = pl.cdiv(B, tile_b)
    Bp = n_tiles * tile_b

    # Layout plumbing in the wrapper (cheap XLA ops on tiny data): put the
    # batch on the lane axis and pad it up to a multiple of the lane tile.
    x_fm = x.T                                        # (8, B)
    if Bp != B:
        x_fm = jnp.pad(x_fm, ((0, 0), (0, Bp - B)))

    # Constant index_map -> block is identical every grid step; Pallas keeps
    # the tiny weights/biases resident in VMEM instead of re-DMA-ing them.
    const = lambda shape: pl.BlockSpec(shape, lambda i: (0,) * len(shape))

    out = pl.pallas_call(
        mlp_kernel,
        out_shape=jax.ShapeDtypeStruct((1, Bp), jnp.float32),
        grid=(n_tiles,),
        in_specs=[
            pl.BlockSpec((8, tile_b), lambda i: (0, i)),
            const(w1.shape), const(b1.shape),
            const(w2.shape), const(b2.shape),
            const(w3.shape), const(b3.shape),
        ],
        out_specs=pl.BlockSpec((1, tile_b), lambda i: (0, i)),
        compiler_params=pltpu.CompilerParams(
            dimension_semantics=("parallel",),   # batch tiles are independent
        ),
    )(x_fm, w1, b1, w2, b2, w3, b3)

    return out[:, :B].T                               # (B, 1)


def init_linear(key, fan_in, fan_out):
    # PyTorch nn.Linear init: U(-1/sqrt(fan_in), 1/sqrt(fan_in)).
    kw, kb = jax.random.split(key)
    bound = 1.0 / (fan_in ** 0.5)
    w = jax.random.uniform(kw, (fan_out, fan_in), jnp.float32, -bound, bound)
    b = jax.random.uniform(kb, (fan_out, 1), jnp.float32, -bound, bound)
    return w, b


def reference_forward(x, w1, b1, w2, b2, w3, b3):
    h = jax.nn.sigmoid(x @ w1.T + b1.T)
    h = jax.nn.sigmoid(h @ w2.T + b2.T)
    return jax.nn.sigmoid(h @ w3.T + b3.T)


if __name__ == "__main__":
    key = jax.random.PRNGKey(0)
    kx, k1, k2, k3 = jax.random.split(key, 4)

    # Small-but-nontrivial batch: 300 rows -> padded to 3 lane tiles of 128,
    # exercising both the multi-step grid and the ragged-edge padding path.
    # NOTE: at tiny batches this whole MLP is ~1 kFLOP; the Pallas call only
    # pays off when fused into a larger pipeline — semantics are what matter.
    B = 300
    x = jax.random.normal(kx, (B, 8), jnp.float32)    # (batch, features), PyTorch layout

    w1, b1 = init_linear(k1, 8, 6)
    w2, b2 = init_linear(k2, 6, 4)
    w3, b3 = init_linear(k3, 4, 1)

    out = mlp_forward(x, w1, b1, w2, b2, w3, b3, tile_b=128)
    out = jax.block_until_ready(out)

    ref = reference_forward(x, w1, b1, w2, b2, w3, b3)
    assert out.shape == (B, 1), out.shape
    assert jnp.allclose(out, ref, atol=1e-5, rtol=1e-5)

    print("KERNEL_OK")
</pallas_src>

<mosaic_0001>
module attributes {stable_mosaic.version = 11 : i64} {
  func.func @mlp_kernel(%arg0: i32, %arg1: memref<8x128xf32, #tpu.memory_space<vmem>>, %arg2: memref<6x8xf32, #tpu.memory_space<vmem>>, %arg3: memref<6x1xf32, #tpu.memory_space<vmem>>, %arg4: memref<4x6xf32, #tpu.memory_space<vmem>>, %arg5: memref<4x1xf32, #tpu.memory_space<vmem>>, %arg6: memref<1x4xf32, #tpu.memory_space<vmem>>, %arg7: memref<1x1xf32, #tpu.memory_space<vmem>>, %arg8: memref<1x128xf32, #tpu.memory_space<vmem>>) attributes {dimension_semantics = [#tpu.dimension_semantics<parallel>], iteration_bounds = array<i64: 3>, scalar_prefetch = 0 : i64, scratch_operands = 0 : i64, tpu.core_type = #tpu.core_type<tc>, window_params = [{transform_indices = @transform_0, window_bounds = array<i64: 8, 128>}, {pipeline_mode = #tpu.pipeline_mode<synchronous>, transform_indices = @transform_1, window_bounds = array<i64: 6, 8>}, {pipeline_mode = #tpu.pipeline_mode<synchronous>, transform_indices = @transform_2, window_bounds = array<i64: 6, 1>}, {pipeline_mode = #tpu.pipeline_mode<synchronous>, transform_indices = @transform_3, window_bounds = array<i64: 4, 6>}, {pipeline_mode = #tpu.pipeline_mode<synchronous>, transform_indices = @transform_4, window_bounds = array<i64: 4, 1>}, {pipeline_mode = #tpu.pipeline_mode<synchronous>, transform_indices = @transform_5, window_bounds = array<i64: 1, 4>}, {pipeline_mode = #tpu.pipeline_mode<synchronous>, transform_indices = @transform_6, window_bounds = array<i64: 1, 1>}, {transform_indices = @transform_7, window_bounds = array<i64: 1, 128>}]} {
    %c0 = arith.constant 0 : index
    %c0_0 = arith.constant 0 : index
    %0 = vector.load %arg1[%c0, %c0_0] : memref<8x128xf32, #tpu.memory_space<vmem>>, vector<8x128xf32>
    %c0_1 = arith.constant 0 : index
    %c0_2 = arith.constant 0 : index
    %1 = vector.load %arg2[%c0_1, %c0_2] : memref<6x8xf32, #tpu.memory_space<vmem>>, vector<6x8xf32>
    %c0_3 = arith.constant 0 : index
    %c0_4 = arith.constant 0 : index
    %2 = vector.load %arg3[%c0_3, %c0_4] : memref<6x1xf32, #tpu.memory_space<vmem>>, vector<6x1xf32>
    %3 = vector.extract_strided_slice %1 {offsets = [0, 0], sizes = [6, 1], strides = [1, 1]} : vector<6x8xf32> to vector<6x1xf32>
    %4 = vector.extract_strided_slice %0 {offsets = [0, 0], sizes = [1, 128], strides = [1, 1]} : vector<8x128xf32> to vector<1x128xf32>
    %5 = vector.broadcast %3 : vector<6x1xf32> to vector<6x128xf32>
    %6 = vector.broadcast %4 : vector<1x128xf32> to vector<6x128xf32>
    %7 = arith.mulf %5, %6 : vector<6x128xf32>
    %8 = vector.broadcast %2 : vector<6x1xf32> to vector<6x128xf32>
    %9 = arith.addf %7, %8 : vector<6x128xf32>
    %10 = vector.extract_strided_slice %1 {offsets = [0, 1], sizes = [6, 1], strides = [1, 1]} : vector<6x8xf32> to vector<6x1xf32>
    %11 = vector.extract_strided_slice %0 {offsets = [1, 0], sizes = [1, 128], strides = [1, 1]} : vector<8x128xf32> to vector<1x128xf32>
    %12 = vector.broadcast %10 : vector<6x1xf32> to vector<6x128xf32>
    %13 = vector.broadcast %11 : vector<1x128xf32> to vector<6x128xf32>
    %14 = arith.mulf %12, %13 : vector<6x128xf32>
    %15 = arith.addf %9, %14 : vector<6x128xf32>
    %16 = vector.extract_strided_slice %1 {offsets = [0, 2], sizes = [6, 1], strides = [1, 1]} : vector<6x8xf32> to vector<6x1xf32>
    %17 = vector.extract_strided_slice %0 {offsets = [2, 0], sizes = [1, 128], strides = [1, 1]} : vector<8x128xf32> to vector<1x128xf32>
    %18 = vector.broadcast %16 : vector<6x1xf32> to vector<6x128xf32>
    %19 = vector.broadcast %17 : vector<1x128xf32> to vector<6x128xf32>
    %20 = arith.mulf %18, %19 : vector<6x128xf32>
    %21 = arith.addf %15, %20 : vector<6x128xf32>
    %22 = vector.extract_strided_slice %1 {offsets = [0, 3], sizes = [6, 1], strides = [1, 1]} : vector<6x8xf32> to vector<6x1xf32>
    %23 = vector.extract_strided_slice %0 {offsets = [3, 0], sizes = [1, 128], strides = [1, 1]} : vector<8x128xf32> to vector<1x128xf32>
    %24 = vector.broadcast %22 : vector<6x1xf32> to vector<6x128xf32>
    %25 = vector.broadcast %23 : vector<1x128xf32> to vector<6x128xf32>
    %26 = arith.mulf %24, %25 : vector<6x128xf32>
    %27 = arith.addf %21, %26 : vector<6x128xf32>
    %28 = vector.extract_strided_slice %1 {offsets = [0, 4], sizes = [6, 1], strides = [1, 1]} : vector<6x8xf32> to vector<6x1xf32>
    %29 = vector.extract_strided_slice %0 {offsets = [4, 0], sizes = [1, 128], strides = [1, 1]} : vector<8x128xf32> to vector<1x128xf32>
    %30 = vector.broadcast %28 : vector<6x1xf32> to vector<6x128xf32>
    %31 = vector.broadcast %29 : vector<1x128xf32> to vector<6x128xf32>
    %32 = arith.mulf %30, %31 : vector<6x128xf32>
    %33 = arith.addf %27, %32 : vector<6x128xf32>
    %34 = vector.extract_strided_slice %1 {offsets = [0, 5], sizes = [6, 1], strides = [1, 1]} : vector<6x8xf32> to vector<6x1xf32>
    %35 = vector.extract_strided_slice %0 {offsets = [5, 0], sizes = [1, 128], strides = [1, 1]} : vector<8x128xf32> to vector<1x128xf32>
    %36 = vector.broadcast %34 : vector<6x1xf32> to vector<6x128xf32>
    %37 = vector.broadcast %35 : vector<1x128xf32> to vector<6x128xf32>
    %38 = arith.mulf %36, %37 : vector<6x128xf32>
    %39 = arith.addf %33, %38 : vector<6x128xf32>
    %40 = vector.extract_strided_slice %1 {offsets = [0, 6], sizes = [6, 1], strides = [1, 1]} : vector<6x8xf32> to vector<6x1xf32>
    %41 = vector.extract_strided_slice %0 {offsets = [6, 0], sizes = [1, 128], strides = [1, 1]} : vector<8x128xf32> to vector<1x128xf32>
    %42 = vector.broadcast %40 : vector<6x1xf32> to vector<6x128xf32>
    %43 = vector.broadcast %41 : vector<1x128xf32> to vector<6x128xf32>
    %44 = arith.mulf %42, %43 : vector<6x128xf32>
    %45 = arith.addf %39, %44 : vector<6x128xf32>
    %46 = vector.extract_strided_slice %1 {offsets = [0, 7], sizes = [6, 1], strides = [1, 1]} : vector<6x8xf32> to vector<6x1xf32>
    %47 = vector.extract_strided_slice %0 {offsets = [7, 0], sizes = [1, 128], strides = [1, 1]} : vector<8x128xf32> to vector<1x128xf32>
    %48 = vector.broadcast %46 : vector<6x1xf32> to vector<6x128xf32>
    %49 = vector.broadcast %47 : vector<1x128xf32> to vector<6x128xf32>
    %50 = arith.mulf %48, %49 : vector<6x128xf32>
    %51 = arith.addf %45, %50 : vector<6x128xf32>
    %52 = arith.negf %51 : vector<6x128xf32>
    %53 = math.exp %52 : vector<6x128xf32>
    %cst = arith.constant 1.000000e+00 : f32
    %54 = vector.broadcast %cst : f32 to vector<6x128xf32>
    %55 = arith.addf %54, %53 : vector<6x128xf32>
    %56 = arith.divf %54, %55 : vector<6x128xf32>
    %c0_5 = arith.constant 0 : index
    %c0_6 = arith.constant 0 : index
    %57 = vector.load %arg4[%c0_5, %c0_6] : memref<4x6xf32, #tpu.memory_space<vmem>>, vector<4x6xf32>
    %c0_7 = arith.constant 0 : index
    %c0_8 = arith.constant 0 : index
    %58 = vector.load %arg5[%c0_7, %c0_8] : memref<4x1xf32, #tpu.memory_space<vmem>>, vector<4x1xf32>
    %59 = vector.extract_strided_slice %57 {offsets = [0, 0], sizes = [4, 1], strides = [1, 1]} : vector<4x6xf32> to vector<4x1xf32>
    %60 = vector.extract_strided_slice %56 {offsets = [0, 0], sizes = [1, 128], strides = [1, 1]} : vector<6x128xf32> to vector<1x128xf32>
    %61 = vector.broadcast %59 : vector<4x1xf32> to vector<4x128xf32>
    %62 = vector.broadcast %60 : vector<1x128xf32> to vector<4x128xf32>
    %63 = arith.mulf %61, %62 : vector<4x128xf32>
    %64 = vector.broadcast %58 : vector<4x1xf32> to vector<4x128xf32>
    %65 = arith.addf %63, %64 : vector<4x128xf32>
    %66 = vector.extract_strided_slice %57 {offsets = [0, 1], sizes = [4, 1], strides = [1, 1]} : vector<4x6xf32> to vector<4x1xf32>
    %67 = vector.extract_strided_slice %56 {offsets = [1, 0], sizes = [1, 128], strides = [1, 1]} : vector<6x128xf32> to vector<1x128xf32>
    %68 = vector.broadcast %66 : vector<4x1xf32> to vector<4x128xf32>
    %69 = vector.broadcast %67 : vector<1x128xf32> to vector<4x128xf32>
    %70 = arith.mulf %68, %69 : vector<4x128xf32>
    %71 = arith.addf %65, %70 : vector<4x128xf32>
    %72 = vector.extract_strided_slice %57 {offsets = [0, 2], sizes = [4, 1], strides = [1, 1]} : vector<4x6xf32> to vector<4x1xf32>
    %73 = vector.extract_strided_slice %56 {offsets = [2, 0], sizes = [1, 128], strides = [1, 1]} : vector<6x128xf32> to vector<1x128xf32>
    %74 = vector.broadcast %72 : vector<4x1xf32> to vector<4x128xf32>
    %75 = vector.broadcast %73 : vector<1x128xf32> to vector<4x128xf32>
    %76 = arith.mulf %74, %75 : vector<4x128xf32>
    %77 = arith.addf %71, %76 : vector<4x128xf32>
    %78 = vector.extract_strided_slice %57 {offsets = [0, 3], sizes = [4, 1], strides = [1, 1]} : vector<4x6xf32> to vector<4x1xf32>
    %79 = vector.extract_strided_slice %56 {offsets = [3, 0], sizes = [1, 128], strides = [1, 1]} : vector<6x128xf32> to vector<1x128xf32>
    %80 = vector.broadcast %78 : vector<4x1xf32> to vector<4x128xf32>
    %81 = vector.broadcast %79 : vector<1x128xf32> to vector<4x128xf32>
    %82 = arith.mulf %80, %81 : vector<4x128xf32>
    %83 = arith.addf %77, %82 : vector<4x128xf32>
    %84 = vector.extract_strided_slice %57 {offsets = [0, 4], sizes = [4, 1], strides = [1, 1]} : vector<4x6xf32> to vector<4x1xf32>
    %85 = vector.extract_strided_slice %56 {offsets = [4, 0], sizes = [1, 128], strides = [1, 1]} : vector<6x128xf32> to vector<1x128xf32>
    %86 = vector.broadcast %84 : vector<4x1xf32> to vector<4x128xf32>
    %87 = vector.broadcast %85 : vector<1x128xf32> to vector<4x128xf32>
    %88 = arith.mulf %86, %87 : vector<4x128xf32>
    %89 = arith.addf %83, %88 : vector<4x128xf32>
    %90 = vector.extract_strided_slice %57 {offsets = [0, 5], sizes = [4, 1], strides = [1, 1]} : vector<4x6xf32> to vector<4x1xf32>
    %91 = vector.extract_strided_slice %56 {offsets = [5, 0], sizes = [1, 128], strides = [1, 1]} : vector<6x128xf32> to vector<1x128xf32>
    %92 = vector.broadcast %90 : vector<4x1xf32> to vector<4x128xf32>
    %93 = vector.broadcast %91 : vector<1x128xf32> to vector<4x128xf32>
    %94 = arith.mulf %92, %93 : vector<4x128xf32>
    %95 = arith.addf %89, %94 : vector<4x128xf32>
    %96 = arith.negf %95 : vector<4x128xf32>
    %97 = math.exp %96 : vector<4x128xf32>
    %cst_9 = arith.constant 1.000000e+00 : f32
    %98 = vector.broadcast %cst_9 : f32 to vector<4x128xf32>
    %99 = arith.addf %98, %97 : vector<4x128xf32>
    %100 = arith.divf %98, %99 : vector<4x128xf32>
    %c0_10 = arith.constant 0 : index
    %c0_11 = arith.constant 0 : index
    %101 = vector.load %arg6[%c0_10, %c0_11] : memref<1x4xf32, #tpu.memory_space<vmem>>, vector<1x4xf32>
    %c0_12 = arith.constant 0 : index
    %c0_13 = arith.constant 0 : index
    %102 = vector.load %arg7[%c0_12, %c0_13] : memref<1x1xf32, #tpu.memory_space<vmem>>, vector<1x1xf32>
    %103 = vector.extract_strided_slice %101 {offsets = [0, 0], sizes = [1, 1], strides = [1, 1]} : vector<1x4xf32> to vector<1x1xf32>
    %104 = vector.extract_strided_slice %100 {offsets = [0, 0], sizes = [1, 128], strides = [1, 1]} : vector<4x128xf32> to vector<1x128xf32>
    %105 = vector.broadcast %103 : vector<1x1xf32> to vector<1x128xf32>
    %106 = arith.mulf %105, %104 : vector<1x128xf32>
    %107 = vector.broadcast %102 : vector<1x1xf32> to vector<1x128xf32>
    %108 = arith.addf %106, %107 : vector<1x128xf32>
    %109 = vector.extract_strided_slice %101 {offsets = [0, 1], sizes = [1, 1], strides = [1, 1]} : vector<1x4xf32> to vector<1x1xf32>
    %110 = vector.extract_strided_slice %100 {offsets = [1, 0], sizes = [1, 128], strides = [1, 1]} : vector<4x128xf32> to vector<1x128xf32>
    %111 = vector.broadcast %109 : vector<1x1xf32> to vector<1x128xf32>
    %112 = arith.mulf %111, %110 : vector<1x128xf32>
    %113 = arith.addf %108, %112 : vector<1x128xf32>
    %114 = vector.extract_strided_slice %101 {offsets = [0, 2], sizes = [1, 1], strides = [1, 1]} : vector<1x4xf32> to vector<1x1xf32>
    %115 = vector.extract_strided_slice %100 {offsets = [2, 0], sizes = [1, 128], strides = [1, 1]} : vector<4x128xf32> to vector<1x128xf32>
    %116 = vector.broadcast %114 : vector<1x1xf32> to vector<1x128xf32>
    %117 = arith.mulf %116, %115 : vector<1x128xf32>
    %118 = arith.addf %113, %117 : vector<1x128xf32>
    %119 = vector.extract_strided_slice %101 {offsets = [0, 3], sizes = [1, 1], strides = [1, 1]} : vector<1x4xf32> to vector<1x1xf32>
    %120 = vector.extract_strided_slice %100 {offsets = [3, 0], sizes = [1, 128], strides = [1, 1]} : vector<4x128xf32> to vector<1x128xf32>
    %121 = vector.broadcast %119 : vector<1x1xf32> to vector<1x128xf32>
    %122 = arith.mulf %121, %120 : vector<1x128xf32>
    %123 = arith.addf %118, %122 : vector<1x128xf32>
    %124 = arith.negf %123 : vector<1x128xf32>
    %125 = math.exp %124 : vector<1x128xf32>
    %cst_14 = arith.constant 1.000000e+00 : f32
    %126 = vector.broadcast %cst_14 : f32 to vector<1x128xf32>
    %127 = arith.addf %126, %125 : vector<1x128xf32>
    %128 = arith.divf %126, %127 : vector<1x128xf32>
    %c0_15 = arith.constant 0 : index
    %c0_16 = arith.constant 0 : index
    %129 = vector.load %arg8[%c0_15, %c0_16] : memref<1x128xf32, #tpu.memory_space<vmem>>, vector<1x128xf32>
    tpu.vector_store %arg8[%c0_15, %c0_16], %128 {strides = array<i32>} : memref<1x128xf32, #tpu.memory_space<vmem>>, vector<1x128xf32>,
    return
  }
  func.func @transform_0(%arg0: i32) -> (i32, i32) {
    %c0_i32 = arith.constant 0 : i32
    %c0_i32_0 = arith.constant 0 : i32
    return %c0_i32, %arg0 : i32, i32
  }
  func.func @transform_1(%arg0: i32) -> (i32, i32) {
    %c0_i32 = arith.constant 0 : i32
    %c0_i32_0 = arith.constant 0 : i32
    %c0_i32_1 = arith.constant 0 : i32
    return %c0_i32, %c0_i32_0 : i32, i32
  }
  func.func @transform_2(%arg0: i32) -> (i32, i32) {
    %c0_i32 = arith.constant 0 : i32
    %c0_i32_0 = arith.constant 0 : i32
    %c0_i32_1 = arith.constant 0 : i32
    return %c0_i32, %c0_i32_0 : i32, i32
  }
  func.func @transform_3(%arg0: i32) -> (i32, i32) {
    %c0_i32 = arith.constant 0 : i32
    %c0_i32_0 = arith.constant 0 : i32
    %c0_i32_1 = arith.constant 0 : i32
    return %c0_i32, %c0_i32_0 : i32, i32
  }
  func.func @transform_4(%arg0: i32) -> (i32, i32) {
    %c0_i32 = arith.constant 0 : i32
    %c0_i32_0 = arith.constant 0 : i32
    %c0_i32_1 = arith.constant 0 : i32
    return %c0_i32, %c0_i32_0 : i32, i32
  }
  func.func @transform_5(%arg0: i32) -> (i32, i32) {
    %c0_i32 = arith.constant 0 : i32
    %c0_i32_0 = arith.constant 0 : i32
    %c0_i32_1 = arith.constant 0 : i32
    return %c0_i32, %c0_i32_0 : i32, i32
  }
  func.func @transform_6(%arg0: i32) -> (i32, i32) {
    %c0_i32 = arith.constant 0 : i32
    %c0_i32_0 = arith.constant 0 : i32
    %c0_i32_1 = arith.constant 0 : i32
    return %c0_i32, %c0_i32_0 : i32, i32
  }
  func.func @transform_7(%arg0: i32) -> (i32, i32) {
    %c0_i32 = arith.constant 0 : i32
    %c0_i32_0 = arith.constant 0 : i32
    return %c0_i32, %arg0 : i32, i32
  }
}

</mosaic_0001>

<bundles_post_ra>
// kernel: tpu_custom_call.1
= control target key start
LH: loop header
LB: loop body
LE: loop exit
PB: predicated region body
PF: predicated region fallthrough
CT: control target
= control target key end

     0   :  { %s1059_s0 = inlined_call_operand.hbm [shape: f32[8,384], index: 0, kind: input, shape index: {}]   ;;  %s1060_s1 = inlined_call_operand.vmem [shape: f32[6,8], index: 1, kind: input, shape index: {}]   ;;  %s1061_s2 = inlined_call_operand.vmem [shape: f32[6,1], index: 2, kind: input, shape index: {}]   ;;  %s1062_s3 = inlined_call_operand.vmem [shape: f32[4,6], index: 3, kind: input, shape index: {}]   ;;  %s1063_s4 = inlined_call_operand.vmem [shape: f32[4,1], index: 4, kind: input, shape index: {}]   ;;  %s1064_s5 = inlined_call_operand.vmem [shape: f32[1,4], index: 5, kind: input, shape index: {}]   ;;  %s1065_s6 = inlined_call_operand.<no memory space> [shape: f32[1,1], index: 6, kind: input, shape index: {}]   ;;  %s1066_s7 = inlined_call_operand.hbm [shape: f32[1,384], index: 7, kind: output, shape index: {}]  }
   0x1   :  { %v12_v0 = vstv %s1065_s6 }
   0x2   :  { %13 = vst [vmem:[#allocation2] sm:$0x1] %v12_v0 }
   0x3   :  { %14 = vsyncpa [#allocation4], 0 }
   0x4   :  { %16 = vsyncpa [#allocation4 + $0x1], 0 }
   0x5   :  { %17 = vsyncpa [#allocation5], 0 }
   0x6   :  { %19 = vsyncpa [#allocation5 + $0x1], 0  ;;  %s862_s26 = smov 0   ;;  %s864_s27 = smov 0  }
   0x7   :  { %s866_s28 = smov 0   ;;  %s868_s29 = smov 0  }
   0x8 LB: > { %s883_s6 = sadd.s32 4294967295, %s807_s29   ;;  %s611_s30 = sadd.s32 4294967294, %s807_s29   ;;  %s807_s29 = sphi %s868_s29, %s1080_s29   ;;  %s803_s28 = sphi %s866_s28, %s1079_s28   ;;  %s799_s27 = sphi %s864_s27, %s1078_s27   ;;  %s795_s26 = sphi %s862_s26, %s1077_s26  }
   0x9   : > { %s887_s8 = sadd.s32 1, %s807_s29   ;;  %s32_s9 = sadd.s32 1, %s803_s28 }
   0xa   : > { %s29_s10 = ssub.s32 %s807_s29, %s887_s8  ;;  %p39_p0 = scmp.ne.s32.totalorder %s803_s28, %s799_s27 }
   0xb   : > { %p30_p1 = scmp.eq.s32.totalorder %s29_s10, 0  ;;  %p40_p2 = scmp.eq.s32.totalorder %s807_s29, 0 }
   0xc   : > { %p45_p3 = scmp.ne.s32.totalorder %s799_s27, %s795_s26  ;;  %p46_p4 = scmp.eq.s32.totalorder %s883_s6, 0 }
   0xd   : > { %s899_s11 = scalar_select %p30_p1, %s803_s28, %s32_s9  }
   0xe   : > { %p901_p5 = por %p40_p2, %p39_p0  ;;  %p905_p6 = por %p46_p4, %p45_p3 }
   0xf   : > { %p195_p7 = scmp.eq.s32.totalorder %s883_s6, 2  ;;  %p201_p8 = scmp.eq.s32.totalorder %s611_s30, 2 }
  0x10   : > { %p636_p9 = scmp.lt.s32.totalorder %s807_s29, 3  ;;  %s239_s16 = sand.u32 1, %s803_s28  }
  0x11   : > { %p911_p10 = por %p195_p7, %p39_p0  ;;  %p915_p11 = por %p201_p8, %p45_p3 }
  0x12   : > { %s615_s17 = sshll.u32 %s807_s29, 7  ;;  %s614_s18 = sshll.u32 %s239_s16, 3 }
  0x13   : > { %s1070_s14 = scalar_select %p911_p10, 1, 0 }
  0x14   : > { %s1071_s15 = scalar_select %p915_p11, 1, 0 }
  0x15   : > { %s924_s21 = scalar_lea.hbm %s1059_s0, %s615_s17  ;;  %s243_s22 = scalar_lea.vmem [#allocation3], %s614_s18 }
  0x16   : > { %s250_s23 = sshll.u32 %s243_s22, 4  ;;  %p928_p12 = pnand %p636_p9, %p901_p5  ;;  %s932_s23 = int_to_ptr.vmem [resolvable:$true] %s250_s23 }
  0x17   : > { %s240_s25 = scalar_lea.sflag [#allocation4], %s239_s16  ;;  %s711_s30 = scalar_lea.hbm %s924_s21, 128 }
  0x18   : > { %p712_p1 = scmp.ne.s32.totalorder %s924_s21, %s711_s30  ;;  %p713_p2 = pneg %p928_p12 }
  0x19   : > { %s716_s12 = scalar_lea.hbm %s1059_s0, 384  ;;  %p717_p5 = scmp.lt.u32.totalorder %s924_s21, %s1059_s0 }
  0x1a   : > { %p714_p3 = pnand %p713_p2, %p712_p1  ;;  %p718_p7 = scmp.lt.u32.totalorder %s716_s12, %s711_s30 }
  0x1b   : > { %p720_p9 = scmp.lt.u32.totalorder %s711_s30, %s924_s21 }
  0x1c   : > { %p715_p4 = pneg %p714_p3  ;;  %p719_p8 = por %p718_p7, %p717_p5 }
  0x1e   : > { %p721_p13 = por %p720_p9, %p719_p8 }
  0x20   : > { %p722_p0 = pnand %p721_p13, %p715_p4 }
  0x22   : > { %725 = shalt.err (!%p722_p0)
}
  0x23   : > { %s726_s16 = scalar_lea.vmem %s932_s23, 128  ;;  %s809_s19 = smov [#allocation3]  }
  0x24   : > { %p727_p1 = scmp.ne.s32.totalorder %s932_s23, %s726_s16  ;;  %s731_s20 = sshll.u32 %s809_s19, 4  ;;  %s732_s20 = int_to_ptr.vmem [resolvable:$false] %s731_s20 }
  0x25   : > { %s733_s22 = scalar_lea.vmem %s732_s20, 256  ;;  %p734_p10 = scmp.lt.s32.totalorder %s932_s23, %s732_s20 }
  0x26   : > { %p729_p3 = pnand %p727_p1, %p713_p2  ;;  %p735_p5 = scmp.lt.s32.totalorder %s733_s22, %s726_s16 }
  0x28   : > { %p730_p11 = pneg %p729_p3  ;;  %p736_p7 = por %p735_p5, %p734_p10 }
  0x2a   : > { %p737_p8 = pnand %p736_p7, %p730_p11 }
  0x2c   : > { %740 = shalt.err (!%p737_p8)
}
  0x2d   : > { %631 = dma.hbm_to_vmem [thread:$0]  (!%p928_p12), %s924_s21, 128, %s932_s23, %s240_s25  }
  0x2e   : > { %p1073_p13 = scmp.lt.s32.totalorder %s807_s29, 4  ;;  %p1074_p0 = scmp.ge.s32.totalorder %s807_s29, 1 }
  0x30   : > { %p256_p2 = pnand %p1074_p0, %p1073_p13 }
  0x31   : > { %s966_s30 = sand.u32 (!%p256_p2), 1, %s799_s27  }
  0x32   : > { %259 = sbr.rel (%p256_p2) target bundleno = 330 (0x14a), region = 48  ;;  %s617_s9 = sshll.u32 (!%p256_p2), %s966_s30, 3 }
  0x33   : > { %s262_s10 = scalar_lea.sflag (!%p256_p2), [#allocation4], %s966_s30  ;;  %s970_s12 = scalar_lea.vmem (!%p256_p2), [#allocation3], %s617_s9 }
  0x39   : > { %786 = dma.done.wait (%p905_p6), %s262_s10, 128  }
  0x3a   : > { %788 = vsyncadd (%p905_p6), %s262_s10, 4294967168  ;;  %v810_v1 = vmov 1   ;;  %v811_v2 = vmov 0   ;;  %v296_v3 = vld [vmem:[%s1060_s1] sm:$0x3f]  ;;  %v812_v5 = vmov 2   ;;  %v303_v15 = vlaneseq }
  0x3b   : > { %679 = vset.pattern.permute.xlu1 %v810_v1  ;;  %678 = vset.pattern.permute.xlu0 %v811_v2  ;;  %v297_v4 = vld [vmem:[%s1061_s2] sm:$0x3f]  ;;  %v813_v6 = vmov 3   ;;  %v814_v7 = vmov 4   ;;  %v815_v8 = vmov 6   ;;  %v816_v9 = vmov 5  }
  0x3c   : > { %315 = vperm.xlu1 %679, %v296_v3   ;;  %300 = vperm.xlu0 %678, %v296_v3   ;;  %v391_v10 = vld [vmem:[%s1063_s4] sm:$0xf]  ;;  %v817_v11 = vmov 7   ;;  %v991_v16 = vshrl.u32 %v303_v15, 7  ;;  %s621_s22 = sshll.u32 %s883_s6, 4  ;;  %s294_s9 = scalar_lea.vmem [#allocation6], %s966_s30 }
  0x3d   : > { %v390_v12 = vld [vmem:[%s1062_s3] sm:$0xf]  ;;  %s545_s10 = sshll.u32 %s294_s9, 4  ;;  %s1016_s23 = scalar_lea.hbm %s1066_s7, %s621_s22  ;;  %s1018_s10 = int_to_ptr.vmem [resolvable:$true] %s545_s10 }
  0x3e   : > { %v464_v13 = vld [vmem:[%s1064_s5] sm:$0x1]  ;;  %v994_v17 = vsub.s32 0, %v991_v16  ;;  %v295_v18 = vld [vmem:[%s970_s12] sm:$0xff]  ;;  %v320_v19 = vsub.s32 1, %v991_v16  ;;  %v330_v21 = vsub.s32 2, %v991_v16 }
  0x3f   : > { %v465_v14 = vld [vmem:[#allocation2] sm:$0x1]  ;;  %v340_v27 = vsub.s32 3, %v991_v16  ;;  %v350_v29 = vsub.s32 4, %v991_v16  ;;  %v360_v37 = vsub.s32 5, %v991_v16  ;;  %v370_v38 = vsub.s32 6, %v991_v16 }
  0x40   : > { %680 = vset.pattern.permute.xlu1 %v812_v5  ;;  %310 = vperm.xlu0 %678, %v297_v4   ;;  %v306_v20 = vrot.slane %v295_v18, %v994_v17  ;;  %v321_v24 = vrot.slane %v295_v18, %v320_v19  ;;  %v331_v26 = vrot.slane %v295_v18, %v330_v21  ;;  %v380_v47 = vsub.s32 7, %v991_v16  ;;  %s533_s24 = scalar_lea.sflag [#allocation5], %s966_s30  ;;  %s741_s25 = scalar_lea.vmem %s1018_s10, 16 }
  0x41   : > { %325 = vperm.xlu1 %680, %v296_v3   ;;  %v341_v34 = vrot.slane %v295_v18, %v340_v27  ;;  %v351_v36 = vrot.slane %v295_v18, %v350_v29  ;;  %v361_v45 = vrot.slane %v295_v18, %v360_v37  ;;  %v371_v46 = vrot.slane %v295_v18, %v370_v38  ;;  %p742_p6 = scmp.ne.s32.totalorder %s1018_s10, %s741_s25  ;;  %p1075_p10 = scmp.ne.s32.totalorder %s1070_s14, 0 }
  0x42   : > { %v381_v53 = vrot.slane %v295_v18, %v380_v47  ;;  %s818_s6 = smov [#allocation6]  }
  0x43   : > { %p743_p11 = pnand %p742_p6, %p1075_p10  ;;  %s745_s13 = sshll.u32 %s818_s6, 4  ;;  %s746_s13 = int_to_ptr.vmem [resolvable:$false] %s745_s13 }
  0x44   : > { %681 = vset.pattern.permute.xlu0 %v813_v6  ;;  %s747_s17 = scalar_lea.vmem %s746_s13, 32  ;;  %p748_p4 = scmp.lt.s32.totalorder %s1018_s10, %s746_s13 }
  0x45   : > { %682 = vset.pattern.permute.xlu1 %v814_v7  ;;  %335 = vperm.xlu0 %681, %v296_v3   ;;  %p744_p12 = pneg %p743_p11  ;;  %p749_p9 = scmp.lt.s32.totalorder %s747_s17, %s741_s25 }
  0x46   : > { %345 = vperm.xlu1 %682, %v296_v3  }
  0x47   : > { %p750_p1 = por %p749_p9, %p748_p4 }
  0x49   : > { %684 = vset.pattern.permute.xlu0 %v815_v8  ;;  %p751_p3 = pnand %p750_p1, %p744_p12 }
  0x4a   : > { %683 = vset.pattern.permute.xlu1 %v816_v9  ;;  %365 = vperm.xlu0 %684, %v296_v3  }
  0x4b   : > { %355 = vperm.xlu1 %683, %v296_v3  }
  0x4e   : > { %687 = vset.pattern.permute.xlu0 %v811_v2 }
  0x4f   : > { %685 = vset.pattern.permute.xlu1 %v817_v11  ;;  %404 = vperm.xlu0 %687, %v391_v10  }
  0x50   : > { %375 = vperm.xlu1 %685, %v296_v3  }
  0x53   : > { %690 = vset.pattern.permute.xlu0 %v813_v6 }
  0x54   : > { %686 = vset.pattern.permute.xlu1 %v811_v2  ;;  %429 = vperm.xlu0 %690, %v390_v12  }
  0x55   : > { %394 = vperm.xlu1 %686, %v390_v12  }
  0x58   : > { %693 = vset.pattern.permute.xlu0 %v811_v2 }
  0x59   : > { %688 = vset.pattern.permute.xlu1 %v810_v1  ;;  %468 = vperm.xlu0 %693, %v464_v13  }
  0x5a   : > { %409 = vperm.xlu1 %688, %v390_v12  }
  0x5d   : > { %696 = vset.pattern.permute.xlu0 %v812_v5 }
  0x5e   : > { %689 = vset.pattern.permute.xlu1 %v812_v5  ;;  %500 = vperm.xlu0 %696, %v464_v13  }
  0x5f   : > { %419 = vperm.xlu1 %689, %v390_v12  }
  0x62   : > { %698 = vset.pattern.permute.xlu0 %v813_v6 }
  0x63   : > { %691 = vset.pattern.permute.xlu1 %v814_v7 }
  0x64   : > { %439 = vperm.xlu1 %691, %v390_v12  }
  0x68   : > { %692 = vset.pattern.permute.xlu1 %v816_v9 }
  0x69   : > { %449 = vperm.xlu1 %692, %v390_v12  }
  0x6d   : > { %694 = vset.pattern.permute.xlu1 %v810_v1 }
  0x6e   : > { %487 = vperm.xlu1 %694, %v464_v13  }
  0x72   : > { %695 = vset.pattern.permute.xlu1 %v811_v2 }
  0x73   : > { %478 = vperm.xlu1 %695, %v465_v14  }
  0x77   : > { %697 = vset.pattern.permute.xlu1 %v813_v6 }
  0x78   : > { %513 = vperm.xlu1 %697, %v464_v13  }
  0xbb   : > { %v316_v22 = vpop.permute.xlu1 %315  ;;  %v301_v23 = vpop.permute.xlu0 %300 }
  0xbc   : > { %v307_v25 = vmul.f32 %v306_v20, %v301_v23  ;;  %v322_v30 = vmul.f32 %v321_v24, %v316_v22 }
  0xbf   : > { %v311_v28 = vpop.permute.xlu0 %310 }
  0xc0   : > { %v313_v31 = vadd.f32 %v311_v28, %v307_v25  ;;  %v326_v32 = vpop.permute.xlu1 %325 }
  0xc1   : > { %v332_v33 = vmul.f32 %v331_v26, %v326_v32 }
  0xc2   : > { %v323_v35 = vadd.f32 %v322_v30, %v313_v31 }
  0xc4   : > { %v333_v39 = vadd.f32 %v332_v33, %v323_v35  ;;  %v336_v40 = vpop.permute.xlu0 %335 }
  0xc5   : > { %v342_v41 = vmul.f32 %v341_v34, %v336_v40  ;;  %v346_v42 = vpop.permute.xlu1 %345 }
  0xc6   : > { %v352_v44 = vmul.f32 %v351_v36, %v346_v42 }
  0xc7   : > { %v343_v43 = vadd.f32 %v342_v41, %v333_v39 }
  0xc9   : > { %v366_v48 = vpop.permute.xlu0 %365  ;;  %v353_v50 = vadd.f32 %v352_v44, %v343_v43 }
  0xca   : > { %v356_v49 = vpop.permute.xlu1 %355  ;;  %v372_v52 = vmul.f32 %v371_v46, %v366_v48 }
  0xcb   : > { %v362_v51 = vmul.f32 %v361_v45, %v356_v49 }
  0xcd   : > { %v363_v54 = vadd.f32 %v362_v51, %v353_v50 }
  0xce   : > { %v405_v2 = vpop.permute.xlu0 %404 }
  0xcf   : > { %v373_v55 = vadd.f32 %v372_v52, %v363_v54  ;;  %v376_v56 = vpop.permute.xlu1 %375 }
  0xd0   : > { %v382_v57 = vmul.f32 %v381_v53, %v376_v56 }
  0xd2   : > { %v383_v58 = vadd.f32 %v382_v57, %v373_v55 }
  0xd3   : > { %v430_v11 = vpop.permute.xlu0 %429 }
  0xd4   : > { %v618_v59 = vmul.f32 -1.442695, %v383_v58  ;;  %v395_v60 = vpop.permute.xlu1 %394 }
  0xd6   : > { %699 = vpow2.f32 %v618_v59 }
  0xd8   : > { %v469_v31 = vpop.permute.xlu0 %468 }
  0xd9   : > { %v410_v63 = vpop.permute.xlu1 %409  ;;  %v474_v35 = vrot.slane %v469_v31, %v994_v17 }
  0xdd   : > { %v501_v32 = vpop.permute.xlu0 %500 }
  0xde   : > { %v420_v0 = vpop.permute.xlu1 %419  ;;  %v506_v33 = vrot.slane %v501_v32, %v994_v17 }
  0xe0   : > { %v700_v61 = vpop.eup %699 }
  0xe1   : > { %v387_v62 = vadd.f32 1.0, %v700_v61 }
  0xe3   : > { %701 = vrcp.f32 %v387_v62  ;;  %v440_v7 = vpop.permute.xlu1 %439 }
  0xe8   : > { %v450_v20 = vpop.permute.xlu1 %449 }
  0xed   : > { %v702_v1 = vpop.eup %701 }
  0xee   : > { %v400_v3 = vrot.slane %v702_v1, %v994_v17  ;;  %v415_v4 = vrot.slane %v702_v1, %v320_v19  ;;  %v425_v6 = vrot.slane %v702_v1, %v330_v21  ;;  %v435_v10 = vrot.slane %v702_v1, %v340_v27  ;;  %v488_v21 = vpop.permute.xlu1 %487 }
  0xef   : > { %v445_v13 = vrot.slane %v702_v1, %v350_v29  ;;  %v455_v15 = vrot.slane %v702_v1, %v360_v37  ;;  %v493_v34 = vrot.slane %v488_v21, %v994_v17 }
  0xf0   : > { %v401_v5 = vmul.f32 %v400_v3, %v395_v60  ;;  %v416_v8 = vmul.f32 %v415_v4, %v410_v63  ;;  %v426_v12 = vmul.f32 %v425_v6, %v420_v0  ;;  %v436_v18 = vmul.f32 %v435_v10, %v430_v11 }
  0xf1   : > { %v446_v22 = vmul.f32 %v445_v13, %v440_v7  ;;  %v456_v24 = vmul.f32 %v455_v15, %v450_v20 }
  0xf2   : > { %v407_v9 = vadd.f32 %v405_v2, %v401_v5  ;;  %v479_v27 = vpop.permute.xlu1 %478 }
  0xf3   : > { %v484_v39 = vrot.slane %v479_v27, %v994_v17 }
  0xf4   : > { %v417_v14 = vadd.f32 %v416_v8, %v407_v9 }
  0xf6   : > { %v427_v16 = vadd.f32 %v426_v12, %v417_v14 }
  0xf7   : > { %v514_v29 = vpop.permute.xlu1 %513 }
  0xf8   : > { %v437_v23 = vadd.f32 %v436_v18, %v427_v16  ;;  %v519_v36 = vrot.slane %v514_v29, %v994_v17 }
  0xfa   : > { %v447_v25 = vadd.f32 %v446_v22, %v437_v23 }
  0xfc   : > { %v457_v26 = vadd.f32 %v456_v24, %v447_v25 }
  0xfe   : > { %v619_v19 = vmul.f32 -1.442695, %v457_v26 }
 0x100   : > { %703 = vpow2.f32 %v619_v19 }
 0x10a   : > { %v704_v28 = vpop.eup %703 }
 0x10b   : > { %v461_v30 = vadd.f32 1.0, %v704_v28 }
 0x10d   : > { %705 = vrcp.f32 %v461_v30 }
 0x117   : > { %v706_v37 = vpop.eup %705 }
 0x118   : > { %v494_v38 = vmul.f32 %v706_v37, %v493_v34  ;;  %v475_v40 = vmul.f32 %v706_v37, %v474_v35  ;;  %v507_v41 = vmul.f32 %v706_v37, %v506_v33  ;;  %v520_v44 = vmul.f32 %v706_v37, %v519_v36 }
 0x11a   : > { %v496_v42 = vrot.slane %v494_v38, 1  ;;  %v485_v43 = vadd.f32 %v484_v39, %v475_v40  ;;  %v509_v46 = vrot.slane %v507_v41, 2  ;;  %v522_v47 = vrot.slane %v520_v44, 3 }
 0x11c   : > { %v498_v45 = vadd.f32 %v496_v42, %v485_v43 }
 0x11e   : > { %v511_v48 = vadd.f32 %v509_v46, %v498_v45 }
 0x120   : > { %v524_v49 = vadd.f32 %v522_v47, %v511_v48 }
 0x122   : > { %v620_v50 = vmul.f32 -1.442695, %v524_v49 }
 0x124   : > { %707 = vpow2.f32 %v620_v50 }
 0x12e   : > { %v708_v51 = vpop.eup %707 }
 0x12f   : > { %v528_v52 = vadd.f32 1.0, %v708_v51 }
 0x131   : > { %709 = vrcp.f32 %v528_v52 }
 0x13b   : > { %v710_v17 = vpop.eup %709 }
 0x13c   : > { %531 = vst [vmem:[%s294_s9] sm:$0x1] %v710_v17 }
 0x13d   : > { %754 = shalt.err (!%p751_p3)
}
 0x13e   : > { %s755_s30 = scalar_lea.hbm %s1016_s23, 16  ;;  %s759_s19 = scalar_lea.hbm %s1066_s7, 48 }
 0x13f   : > { %p756_p5 = scmp.ne.s32.totalorder %s1016_s23, %s755_s30  ;;  %p760_p13 = scmp.lt.u32.totalorder %s1016_s23, %s1066_s7 }
 0x140   : > { %p761_p0 = scmp.lt.u32.totalorder %s759_s19, %s755_s30  ;;  %p763_p6 = scmp.lt.u32.totalorder %s755_s30, %s1016_s23 }
 0x141   : > { %p757_p7 = pnand %p756_p5, %p1075_p10 }
 0x142   : > { %p762_p2 = por %p761_p0, %p760_p13 }
 0x143   : > { %p758_p8 = pneg %p757_p7 }
 0x144   : > { %p764_p11 = por %p763_p6, %p762_p2 }
 0x146   : > { %p765_p12 = pnand %p764_p11, %p758_p8 }
 0x148   : > { %768 = shalt.err (!%p765_p12)
}
 0x149   : > { %626 = dma.vmem_to_hbm [thread:$0]  (%p1075_p10), %s1018_s10, 16, %s1016_s23, %s533_s24  }
 0x14a PF: > { %p637_p4 = scmp.ge.s32.totalorder %s807_s29, 2  ;;  %s557_s9 = sand.u32 1, %s795_s26  }
 0x14b   : > { %p1076_p9 = scmp.ne.s32.totalorder %s1071_s15, 0  ;;  %s558_s12 = scalar_lea.sflag [#allocation5], %s557_s9 }
 0x14d   : > { %p633_p1 = pnand %p637_p4, %p1076_p9 }
 0x14f   : > { %790 = dma.done.wait (!%p633_p1), %s558_s12, 16  }
 0x150   : > { %792 = vsyncadd (!%p633_p1), %s558_s12, 4294967280  ;;  %p22_p3 = scmp.ge.s32.totalorder %s887_s8, 5   ;;  %s1077_s26 = smov %s799_s27 }
 0x151   : > { %s1078_s27 = smov %s803_s28  ;;  %s1079_s28 = smov %s899_s11 }
 0x152   : > { %s1080_s29 = smov %s887_s8  ;;  %24 = sbr.rel (!%p22_p3) target bundleno = 8 (0x8), region = 93 }
 0x159   :  { %562 = vsyncpa [#allocation4], 1 }
 0x15a   :  { %564 = vsyncpa [#allocation4 + $0x1], 1 }
 0x15b   :  { %565 = vsyncpa [#allocation5], 1 }
 0x15c   :  { %567 = vsyncpa [#allocation5 + $0x1], 1 }

</bundles_post_ra>
